<compile_context>
chip_gen: v6e
topology: v6e:2x2x1
jax: 0.10.0
libtpu: 0.0.40
codegen_flags: <defaults>
</compile_context>

<pallas_src>
import jax
import jax.numpy as jnp
from jax.experimental import pallas as pl
from jax.experimental.pallas import tpu as pltpu

_SQRT_2_OVER_PI = 0.7978845608028654
_GELU_C = 0.044715 * _SQRT_2_OVER_PI  # folded constant


def conv1d_gelu_kernel(x_ref, w_ref, b_ref, o_ref):
    """Fused Conv1d(C_in -> C_out, K=2, stride=1) + tanh-approx GELU.

    x_ref : (C_in, Lp + 1)        VMEM  (length padded so both taps span Lp lanes)
    w_ref : (C_out, C_in * K)     VMEM  column order: k * C_in + ci
    b_ref : (C_out, 1)            VMEM
    o_ref : (C_out, Lp)           VMEM  Lp is a multiple of 128 (lane-dense store)
    """
    c_in = x_ref.shape[0]
    c_out, Lp = o_ref.shape

    # im2col of the two conv taps: rows ordered [k=0: ci=0..c_in-1, k=1: ...]
    x0 = x_ref[:, 0:Lp]            # tap k = 0, (c_in, Lp)
    x1 = x_ref[:, 1:Lp + 1]        # tap k = 1, (c_in, Lp)
    xcol = jnp.concatenate([x0, x1], axis=0)        # (c_in*K, Lp)

    # One MXU dot replaces the per-channel scalar MAC tree; bias is one VPU add.
    v1 = jnp.dot(w_ref[...], xcol,
                 preferred_element_type=jnp.float32) + b_ref[...]   # (c_out, Lp)

    # GELU (tanh approx) applied once on the whole block; tanh goes to the EUP.
    t = v1 * (_SQRT_2_OVER_PI + _GELU_C * (v1 * v1))
    o_ref[...] = (0.5 * v1) * (1.0 + jnp.tanh(t))    # single full-tile store


def model_forward(x_ncl, weight, bias):
    """x_ncl: (1, C_in, L) float32 (PyTorch NCL layout).
    weight: (C_out, C_in, K=2), bias: (C_out,).
    Returns (1, C_out, L_out) float32, L_out = L - 1."""
    n, c_in, L = x_ncl.shape
    c_out, _, k = weight.shape
    assert n == 1 and k == 2
    L_out = L - k + 1

    # Pad output length to a multiple of 128 lanes -> unmasked full-vreg stores.
    Lp = max(128, ((L_out + 127) // 128) * 128)

    x_cl = x_ncl[0]                                   # (C_in, L)
    x_pad = jnp.pad(x_cl, ((0, 0), (0, Lp + 1 - L)))  # (C_in, Lp + 1)

    # w2d[co, k*C_in + ci] = weight[co, ci, k]  (matches im2col row order)
    w2d = jnp.transpose(weight, (0, 2, 1)).reshape(c_out, k * c_in)
    b_col = bias.reshape(c_out, 1)

    vmem = pl.BlockSpec(memory_space=pltpu.MemorySpace.VMEM)

    out_padded = pl.pallas_call(
        conv1d_gelu_kernel,
        out_shape=jax.ShapeDtypeStruct((c_out, Lp), jnp.float32),
        in_specs=[vmem, vmem, vmem],
        out_specs=vmem,
    )(x_pad, w2d, b_col)

    # TODO(synk): for L >> a few K or batch > 1, add a "parallel" grid over
    # 128-multiple L-tiles (k=2 halo via an over-fetched input tile) and size
    # tiles against v7x's 64 MiB VMEM; at this size a single call is optimal.
    return out_padded[None, :, :L_out]                # (1, C_out, L_out)


def reference_forward(x_ncl, weight, bias):
    """Pure-JAX reference (lax conv + explicit GELU sequence) for verification."""
    v1 = jax.lax.conv_general_dilated(
        x_ncl, weight, window_strides=(1,), padding="VALID",
        dimension_numbers=("NCH", "OIH", "NCH"))
    v1 = v1 + bias[None, :, None]
    v2 = v1 * 0.5
    v5 = v1 * v1 * v1 * 0.044715
    v7 = (v1 + v5) * 0.7978845608028654
    return v2 * (jnp.tanh(v7) + 1.0)


if __name__ == "__main__":
    key = jax.random.PRNGKey(0)
    kx, kw, kb = jax.random.split(key, 3)

    C_IN, C_OUT, K, L = 3, 8, 2, 64
    x = jax.random.normal(kx, (1, C_IN, L), dtype=jnp.float32)

    # Deterministic parameter init (mimics PyTorch uniform(-bound, bound)).
    fan_in = C_IN * K
    bound = 1.0 / (fan_in ** 0.5)
    weight = jax.random.uniform(kw, (C_OUT, C_IN, K), jnp.float32, -bound, bound)
    bias = jax.random.uniform(kb, (C_OUT,), jnp.float32, -bound, bound)

    out = jax.block_until_ready(model_forward(x, weight, bias))
    ref = jax.block_until_ready(reference_forward(x, weight, bias))

    assert out.shape == (1, C_OUT, L - 1), out.shape
    assert jnp.allclose(out, ref, atol=1e-5, rtol=1e-5), "mismatch vs reference"

    print("KERNEL_OK")
</pallas_src>

<mosaic_0001>
module attributes {stable_mosaic.version = 11 : i64} {
  func.func @conv1d_gelu_kernel(%arg0: memref<3x129xf32, #tpu.memory_space<vmem>>, %arg1: memref<8x6xf32, #tpu.memory_space<vmem>>, %arg2: memref<8x1xf32, #tpu.memory_space<vmem>>, %arg3: memref<8x128xf32, #tpu.memory_space<vmem>>) attributes {dimension_semantics = [], scalar_prefetch = 0 : i64, scratch_operands = 0 : i64, tpu.core_type = #tpu.core_type<tc>} {
    %c0 = arith.constant 0 : index
    %c0_0 = arith.constant 0 : index
    %0 = vector.load %arg0[%c0, %c0_0] : memref<3x129xf32, #tpu.memory_space<vmem>>, vector<3x128xf32>
    %c0_1 = arith.constant 0 : index
    %c1 = arith.constant 1 : index
    %1 = vector.load %arg0[%c0_1, %c1] : memref<3x129xf32, #tpu.memory_space<vmem>>, vector<3x128xf32>
    %2 = tpu.concatenate %0, %1 in 0 : vector<3x128xf32>, vector<3x128xf32> -> vector<6x128xf32>
    %c0_2 = arith.constant 0 : index
    %c0_3 = arith.constant 0 : index
    %3 = vector.load %arg1[%c0_2, %c0_3] : memref<8x6xf32, #tpu.memory_space<vmem>>, vector<8x6xf32>
    %cst = arith.constant dense<0.000000e+00> : vector<8x128xf32>
    %4 = tpu.matmul %3, %2, %cst {dimension_numbers = #tpu.dot_dimension_numbers<[1], [0], [0], [1], [0, 0, 1, 1], [], []>} : vector<8x6xf32>, vector<6x128xf32>, vector<8x128xf32> -> vector<8x128xf32>
    %c0_4 = arith.constant 0 : index
    %c0_5 = arith.constant 0 : index
    %5 = vector.load %arg2[%c0_4, %c0_5] : memref<8x1xf32, #tpu.memory_space<vmem>>, vector<8x1xf32>
    %6 = vector.broadcast %5 : vector<8x1xf32> to vector<8x128xf32>
    %7 = arith.addf %4, %6 : vector<8x128xf32>
    %8 = arith.mulf %7, %7 : vector<8x128xf32>
    %cst_6 = arith.constant 0.0356774069 : f32
    %9 = vector.broadcast %cst_6 : f32 to vector<8x128xf32>
    %10 = arith.mulf %9, %8 : vector<8x128xf32>
    %cst_7 = arith.constant 0.797884583 : f32
    %11 = vector.broadcast %cst_7 : f32 to vector<8x128xf32>
    %12 = arith.addf %11, %10 : vector<8x128xf32>
    %13 = arith.mulf %7, %12 : vector<8x128xf32>
    %cst_8 = arith.constant 5.000000e-01 : f32
    %14 = vector.broadcast %cst_8 : f32 to vector<8x128xf32>
    %15 = arith.mulf %14, %7 : vector<8x128xf32>
    %16 = math.tanh %13 : vector<8x128xf32>
    %cst_9 = arith.constant 1.000000e+00 : f32
    %17 = vector.broadcast %cst_9 : f32 to vector<8x128xf32>
    %18 = arith.addf %17, %16 : vector<8x128xf32>
    %19 = arith.mulf %15, %18 : vector<8x128xf32>
    %c0_10 = arith.constant 0 : index
    %c0_11 = arith.constant 0 : index
    %20 = vector.load %arg3[%c0_10, %c0_11] : memref<8x128xf32, #tpu.memory_space<vmem>>, vector<8x128xf32>
    tpu.vector_store %arg3[%c0_10, %c0_11], %19 {strides = array<i32>} : memref<8x128xf32, #tpu.memory_space<vmem>>, vector<8x128xf32>,
    return
  }
}

</mosaic_0001>

<bundles_post_ra>
// kernel: tpu_custom_call.1
= control target key start
LH: loop header
LB: loop body
LE: loop exit
PB: predicated region body
PF: predicated region fallthrough
CT: control target
= control target key end

     0   :  { %8 = vsyncpa [#allocation3], 0  ;;  %s256_s0 = inlined_call_operand.vmem [shape: f32[3,129], index: 0, kind: input, shape index: {}]   ;;  %s257_s1 = inlined_call_operand.hbm [shape: f32[8,6], index: 1, kind: input, shape index: {}]   ;;  %s258_s2 = inlined_call_operand.vmem [shape: f32[8,1], index: 2, kind: input, shape index: {}]   ;;  %s259_s3 = inlined_call_operand.hbm [shape: f32[8,128], index: 3, kind: output, shape index: {}]  }
   0x1   :  { %9 = vsyncpa [#allocation4], 0  ;;  %s215_s12 = smov [#allocation2]  }
   0x2   :  { %s18_s13 = sshll.u32 %s215_s12, 4  ;;  %s19_s13 = int_to_ptr.vmem [resolvable:$true] %s18_s13 }
   0x3   :  { %s179_s14 = scalar_lea.vmem %s19_s13, 128  ;;  %p184_p1 = scmp.lt.s32.totalorder %s19_s13, %s19_s13 }
   0x4   :  { %p180_p0 = scmp.ne.s32.totalorder %s19_s13, %s179_s14  ;;  %p185_p2 = scmp.lt.s32.totalorder %s179_s14, %s179_s14 }
   0x6   :  { %p186_p3 = por %p185_p2, %p184_p1 }
   0x8   :  { %p187_p4 = pnand %p186_p3, %p180_p0 }
   0xa   :  { %190 = shalt.err (!%p187_p4)
}
   0xb   :  { %21 = dma.hbm_to_vmem [thread:$0]  %s257_s1, 128, %s19_s13, [#allocation3]  }
   0xc   :  { %211 = dma.done.wait [#allocation3], 128  }
   0xd   :  { %212 = vsyncadd [#allocation3], 4294967168  ;;  %v216_v0 = vmov 0.0   ;;  %vm217_vm0 = vmmov 0   ;;  %v218_v1 = vmov 0   ;;  %v43_v5 = vld [vmem:[%s258_s2] sm:$0xff] }
   0xe   :  { %155 = vmatprep.subr.mxu0 %v216_v0  ;;  %157 = vmatprep.mubr.msk.f32.mxu0 %vm217_vm0, %v216_v0  ;;  %v28_v2 = vld [vmem:[%s256_s0] sm:$0x77]  ;;  %s219_s1 = smov 127   ;;  %vm37_vm1 = vcmask 1039360   ;;  %vm40_vm2 = vcmask 1042432   ;;  %vm53_vm3 = vcmask 1045504  }
   0xf   :  { %166 = vset.pattern.permute.xlu1 %v218_v1  ;;  %167 = vset.pattern.permute.xlu0 %v218_v1  ;;  %v31_v3 = vrot.slane %v28_v2, 5  ;;  %v30_v4 = vcombine.high %v28_v2, %v28_v2  ;;  %v27_v8 = vld [vmem:[%s256_s0] sm:$0x7]  ;;  %vm49_vm4 = vcmask 48128   ;;  %s220_s0 = smov [#allocation5]  }
  0x10   :  { %46 = vperm.xlu1 %166, %v43_v5   ;;  %v42_v11 = vld [vmem:[#allocation2] sm:$0xff]  ;;  %s142_s2 = sshll.u32 %s220_s0, 4  ;;  %s143_s2 = int_to_ptr.vmem [resolvable:$true] %s142_s2 }
  0x11   :  { %33 = vrot.lane.b32.xlu0 %v31_v3, %s219_s1  ;;  %v32_v6 = vrot.slane %v30_v4, 5  ;;  %s191_s23 = scalar_lea.vmem %s143_s2, 128  ;;  %p196_p6 = scmp.lt.s32.totalorder %s143_s2, %s143_s2 }
  0x12   :  { %p192_p5 = scmp.ne.s32.totalorder %s143_s2, %s191_s23  ;;  %p197_p7 = scmp.lt.s32.totalorder %s191_s23, %s191_s23 }
  0x14   :  { %p198_p8 = por %p197_p7, %p196_p6 }
  0x15   :  { %35 = vrot.lane.b32.xlu0 %v32_v6, %s219_s1 }
  0x16   :  { %p199_p9 = pnand %p198_p8, %p192_p5 }
  0x83   :  { %v34_v7 = vpop.permute.xlu0 %33 }
  0x87   :  { %v36_v9 = vpop.permute.xlu0 %35 }
  0x88   :  { %v38_v10 = vsel %vm37_vm1, %v34_v7, %v36_v9 }
  0x89   :  { %v41_v12 = vsel %vm40_vm2, %v27_v8, %v38_v10 }
  0x8a   :  { %156 = vmatpush3.msk.msra.mxu0 %vm53_vm3, %v41_v12 }
  0x8b   :  { %158 = vmatmul.mubr.msk.f32.vlgmr.msra.gmra.mxu0 %vm49_vm4, %v42_v11  ;;  %v47_v13 = vpop.permute.xlu1 %46 }
 0x14b   :  { %v123_v14 = vpop.f32.mrf.mxu0 }
 0x14c   :  { %v124_v15 = vadd.f32 %v123_v14, %v47_v13 }
 0x14d   :  { %v159_v16 = vpop.f32.mrf.mxu0 }
 0x14e   :  { %v127_v17 = vmul.f32 %v124_v15, %v124_v15  ;;  %v131_v22 = vmul.f32 0.5, %v124_v15 }
 0x150   :  { %v128_v18 = vmul.f32 0.035677407, %v127_v17 }
 0x152   :  { %v129_v19 = vadd.f32 0.7978846, %v128_v18 }
 0x154   :  { %v130_v20 = vmul.f32 %v129_v19, %v124_v15 }
 0x156   :  { %169 = vtanh.f32 %v130_v20 }
 0x163   :  { %v170_v21 = vpop.eup %169 }
 0x164   :  { %v133_v23 = vadd.f32 1.0, %v170_v21 }
 0x166   :  { %v134_v24 = vmul.f32 %v133_v23, %v131_v22 }
 0x168   :  { %135 = vst [vmem:[#allocation5] sm:$0xff] %v134_v24 }
 0x169   :  { %202 = shalt.err (!%p199_p9)
}
 0x16a   :  { %145 = dma.vmem_to_hbm [thread:$0]  %s143_s2, 128, %s259_s3, [#allocation4]  }
 0x16b   :  { %213 = dma.done.wait [#allocation4], 128  }
 0x16c   :  { %214 = vsyncadd [#allocation4], 4294967168 }
 0x16d   :  { %149 = vsyncpa [#allocation3], 1 }
 0x16e   :  { %150 = vsyncpa [#allocation4], 1 }

</bundles_post_ra>
